<compile_context>
chip_gen: v7x
topology: tpu7x:2x2x1
jax: 0.10.0
libtpu: 0.0.40
codegen_flags: <defaults>
</compile_context>

<pallas_src>
import functools

import jax
import jax.numpy as jnp
from jax.experimental import pallas as pl
from jax.experimental.pallas import tpu as pltpu  # noqa: F401  (kept for TPU-specific knobs)


def _normal_fused_kernel(x_ref, w_ref, b_ref, mu_ref, sigma_ref, *, o):
    """x: [B, I]; w: [I, 2*O]; b: [1, 2*O]; mu: [B, O]; sigma: [B, O].

    Columns [0, O)  of the fused matmul hold mu,
    columns [O, 2O) hold 0.5 * log_var (the 0.5 is pre-folded into w/b),
    so sigma = exp(y[:, O:2O]) + 1e-4.
    """
    x = x_ref[...]                                           # [B, I]
    # Single fused MXU matmul for both heads, f32 accumulation.
    y = jnp.dot(x, w_ref[...], preferred_element_type=jnp.float32) + b_ref[...]
    mu_ref[...] = y[:, :o].astype(mu_ref.dtype)
    # exp runs on the EUP (separate bundle slot) and only over the sigma half.
    sigma_ref[...] = (jnp.exp(y[:, o:2 * o]) + 1e-4).astype(sigma_ref.dtype)


def fuse_normal_params(w_mu, b_mu, w_lv, b_lv):
    """One-time parameter preparation (hoisted out of the forward path).

    w_*: [O, I] (PyTorch nn.Linear layout), b_*: [O].
    The 0.5 log-var scale is folded in here so the kernel epilogue is exp+add.
    Returns (w_fused [I, 2*O], b_fused [1, 2*O], O).
    """
    o, i = w_mu.shape
    w = jnp.concatenate([w_mu.T, 0.5 * w_lv.T], axis=1)       # [I, 2*O]
    b = jnp.concatenate([b_mu, 0.5 * b_lv], axis=0)[None, :]  # [1, 2*O]
    return w, b, o


@functools.partial(jax.jit, static_argnames=("o",))
def normal_forward(x, w_fused, b_fused, o):
    """x: [B, I]; fused params from fuse_normal_params. Returns (mu, sigma)."""
    B, I = x.shape
    P = w_fused.shape[1]

    full = lambda shape: pl.BlockSpec(shape, lambda: (0,) * len(shape))
    mu, sigma = pl.pallas_call(
        functools.partial(_normal_fused_kernel, o=o),
        out_shape=(
            jax.ShapeDtypeStruct((B, o), jnp.float32),
            jax.ShapeDtypeStruct((B, o), jnp.float32),
        ),
        grid=(),
        in_specs=[
            full((B, I)),
            full((I, P)),
            full((1, P)),
        ],
        out_specs=(full((B, o)), full((B, o))),
    )(x, w_fused, b_fused)

    # TODO(synk): td.Normal is a distribution object (sampling/log_prob); the
    # kernel returns its parameters (mu, sigma) which fully define it.
    return mu, sigma


def _init_linear(key, i, o):
    # Deterministic init mimicking nn.Linear default: U(-1/sqrt(i), 1/sqrt(i)).
    kw, kb = jax.random.split(key)
    bound = 1.0 / jnp.sqrt(i)
    w = jax.random.uniform(kw, (o, i), jnp.float32, -bound, bound)
    b = jax.random.uniform(kb, (o,), jnp.float32, -bound, bound)
    return w, b


if __name__ == "__main__":
    B, I, O = 8, 32, 32

    key = jax.random.PRNGKey(0)
    kx, kmu, klv = jax.random.split(key, 3)

    x = jax.random.normal(kx, (B, I), jnp.float32)
    w_mu, b_mu = _init_linear(kmu, I, O)
    w_lv, b_lv = _init_linear(klv, I, O)

    # One-time param prep (would live at module-init time in a real model).
    w_fused, b_fused, o = fuse_normal_params(w_mu, b_mu, w_lv, b_lv)
    w_fused, b_fused = jax.block_until_ready((w_fused, b_fused))

    mu, sigma = normal_forward(x, w_fused, b_fused, o)
    jax.block_until_ready((mu, sigma))

    # Reference check in plain JAX (sigma checked with tight relative tol so a
    # missing 1e-4 floor or dropped 0.5 scale would be caught).
    mu_ref = x @ w_mu.T + b_mu
    sigma_ref = jnp.exp(0.5 * (x @ w_lv.T + b_lv)) + 1e-4
    assert mu.shape == (B, O) and sigma.shape == (B, O)
    assert jnp.allclose(mu, mu_ref, atol=1e-5), "mu mismatch"
    assert jnp.allclose(sigma, sigma_ref, rtol=1e-5, atol=1e-7), "sigma mismatch"

    print("KERNEL_OK")
</pallas_src>

<mosaic_0001>
module attributes {stable_mosaic.version = 11 : i64} {
  func.func @_normal_fused_kernel(%arg0: memref<8x32xf32, #tpu.memory_space<vmem>>, %arg1: memref<32x64xf32, #tpu.memory_space<vmem>>, %arg2: memref<1x64xf32, #tpu.memory_space<vmem>>, %arg3: memref<8x32xf32, #tpu.memory_space<vmem>>, %arg4: memref<8x32xf32, #tpu.memory_space<vmem>>) attributes {dimension_semantics = [], scalar_prefetch = 0 : i64, scratch_operands = 0 : i64, tpu.core_type = #tpu.core_type<tc>} {
    %c0 = arith.constant 0 : index
    %c0_0 = arith.constant 0 : index
    %0 = vector.load %arg0[%c0, %c0_0] : memref<8x32xf32, #tpu.memory_space<vmem>>, vector<8x32xf32>
    %c0_1 = arith.constant 0 : index
    %c0_2 = arith.constant 0 : index
    %1 = vector.load %arg1[%c0_1, %c0_2] : memref<32x64xf32, #tpu.memory_space<vmem>>, vector<32x64xf32>
    %cst = arith.constant dense<0.000000e+00> : vector<8x64xf32>
    %2 = tpu.matmul %0, %1, %cst {dimension_numbers = #tpu.dot_dimension_numbers<[1], [0], [0], [1], [0, 0, 1, 1], [], []>} : vector<8x32xf32>, vector<32x64xf32>, vector<8x64xf32> -> vector<8x64xf32>
    %c0_3 = arith.constant 0 : index
    %c0_4 = arith.constant 0 : index
    %3 = vector.load %arg2[%c0_3, %c0_4] : memref<1x64xf32, #tpu.memory_space<vmem>>, vector<1x64xf32>
    %4 = vector.broadcast %3 : vector<1x64xf32> to vector<8x64xf32>
    %5 = arith.addf %2, %4 : vector<8x64xf32>
    %6 = vector.extract_strided_slice %5 {offsets = [0, 0], sizes = [8, 32], strides = [1, 1]} : vector<8x64xf32> to vector<8x32xf32>
    %c0_5 = arith.constant 0 : index
    %c0_6 = arith.constant 0 : index
    %7 = vector.load %arg3[%c0_5, %c0_6] : memref<8x32xf32, #tpu.memory_space<vmem>>, vector<8x32xf32>
    tpu.vector_store %arg3[%c0_5, %c0_6], %6 {strides = array<i32>} : memref<8x32xf32, #tpu.memory_space<vmem>>, vector<8x32xf32>,
    %8 = vector.extract_strided_slice %5 {offsets = [0, 32], sizes = [8, 32], strides = [1, 1]} : vector<8x64xf32> to vector<8x32xf32>
    %9 = math.exp %8 : vector<8x32xf32>
    %cst_7 = arith.constant 9.99999974E-5 : f32
    %10 = vector.broadcast %cst_7 : f32 to vector<8x32xf32>
    %11 = arith.addf %9, %10 : vector<8x32xf32>
    %c0_8 = arith.constant 0 : index
    %c0_9 = arith.constant 0 : index
    %12 = vector.load %arg4[%c0_8, %c0_9] : memref<8x32xf32, #tpu.memory_space<vmem>>, vector<8x32xf32>
    tpu.vector_store %arg4[%c0_8, %c0_9], %11 {strides = array<i32>} : memref<8x32xf32, #tpu.memory_space<vmem>>, vector<8x32xf32>,
    return
  }
}

</mosaic_0001>

<bundles_post_ra>
// kernel: normal_forward.1
= control target key start
LH: loop header
LB: loop body
LE: loop exit
PB: predicated region body
PF: predicated region fallthrough
CT: control target
= control target key end

     0   :  { %10 = vsyncpa [#allocation3], 0  ;;  %s397_s0 = inlined_call_operand.hbm [shape: f32[8,32], index: 0, kind: input, shape index: {}]   ;;  %s398_s1 = inlined_call_operand.hbm [shape: f32[32,64], index: 1, kind: input, shape index: {}]   ;;  %s399_s2 = inlined_call_operand.vmem [shape: f32[1,64], index: 2, kind: input, shape index: {}]   ;;  %s400_s3 = inlined_call_operand.hbm [shape: f32[8,32], index: 3, kind: output, shape index: {0}]   ;;  %s401_s4 = inlined_call_operand.hbm [shape: f32[8,32], index: 4, kind: output, shape index: {1}]  }
   0x1   :  { %11 = vsyncpa [#allocation6], 0 }
   0x2   :  { %12 = vsyncpa [#allocation4], 0 }
   0x3   :  { %13 = vsyncpa [#allocation9], 0  ;;  %s301_s15 = smov [#allocation2]   ;;  %s302_s17 = smov [#allocation5]  }
   0x4   :  { %s20_s16 = sshll.u32 %s301_s15, 4  ;;  %s29_s18 = sshll.u32 %s302_s17, 4  ;;  %s21_s16 = int_to_ptr.vmem [resolvable:$true] %s20_s16  ;;  %s336_s18 = int_to_ptr.vmem [resolvable:$true] %s29_s18 }
   0x5   :  { %s205_s21 = scalar_lea.hbm %s397_s0, 128 }
   0x6   :  { %p206_p0 = scmp.ne.s32.totalorder %s397_s0, %s205_s21  ;;  %p209_p1 = scmp.lt.u32.totalorder %s205_s21, %s397_s0 }
   0x8   :  { %p211_p2 = pnand %p209_p1, %p206_p0 }
   0xa   :  { %214 = shalt.err (!%p211_p2)
}
   0xb   :  { %s215_s26 = scalar_lea.vmem %s21_s16, 128  ;;  %p220_p4 = scmp.lt.s32.totalorder %s21_s16, %s21_s16 }
   0xc   :  { %p216_p3 = scmp.ne.s32.totalorder %s21_s16, %s215_s26  ;;  %p221_p5 = scmp.lt.s32.totalorder %s215_s26, %s215_s26 }
   0xe   :  { %p222_p6 = por %p221_p5, %p220_p4 }
  0x10   :  { %p223_p7 = pnand %p222_p6, %p216_p3 }
  0x12   :  { %226 = shalt.err (!%p223_p7)
}
  0x13   :  { %23 = dma.hbm_to_vmem [thread:$0]  %s397_s0, 128, %s21_s16, [#allocation3]  }
  0x14   :  { %s227_s5 = scalar_lea.hbm %s398_s1, 512 }
  0x15   :  { %p228_p8 = scmp.ne.s32.totalorder %s398_s1, %s227_s5  ;;  %p231_p9 = scmp.lt.u32.totalorder %s227_s5, %s398_s1 }
  0x17   :  { %p233_p10 = pnand %p231_p9, %p228_p8 }
  0x19   :  { %236 = shalt.err (!%p233_p10)
}
  0x1a   :  { %s237_s10 = scalar_lea.vmem %s336_s18, 512  ;;  %p242_p12 = scmp.lt.s32.totalorder %s336_s18, %s336_s18 }
  0x1b   :  { %p238_p11 = scmp.ne.s32.totalorder %s336_s18, %s237_s10  ;;  %p243_p13 = scmp.lt.s32.totalorder %s237_s10, %s237_s10 }
  0x1d   :  { %p244_p0 = por %p243_p13, %p242_p12 }
  0x1f   :  { %p245_p1 = pnand %p244_p0, %p238_p11 }
  0x21   :  { %248 = shalt.err (!%p245_p1)
}
  0x22   :  { %s303_s0 = smov 128   ;;  %s304_s11 = smov 8  }
  0x23   :  { %35 = dma.hbm_to_vmem [thread:$0]  %s398_s1, 512, %s336_s18, [#allocation6], %s303_s0, %s303_s0, %s304_s11  }
  0x24   :  { %293 = dma.done.wait [#allocation3], 128  }
  0x25   :  { %294 = vsyncadd [#allocation3], 4294967168 }
  0x26   :  { %295 = dma.done.wait [#allocation6], 512  }
  0x27   :  { %296 = vsyncadd [#allocation6], 4294966784  ;;  %v305_v0 = vmov 0.0|0.0   ;;  %vm306_vm0 = vmmov 0   ;;  %v307_v1 = vmov 0.0   ;;  %v45_v2 = vld [vmem:[#allocation5] sm:$0xff] }
  0x28   :  { %187 = vmatprep.subr.bf16.mxu0 %v305_v0  ;;  %184 = vmatprep.mubr.msk.f32.mxu0 %vm306_vm0, %v307_v1  ;;  %v46_v3 = vld [vmem:[#allocation5 + $0x8] sm:$0xff]  ;;  %v47_v4 = vld [vmem:[#allocation5 + $0x10] sm:$0xff]  ;;  %v48_v6 = vld [vmem:[#allocation5 + $0x18] sm:$0xff]  ;;  %vm56_vm1 = vcmask 261120   ;;  %s308_s15 = smov [#allocation7]  }
  0x29   :  { %v188_v5 = vpack.c.bf16 %v46_v3, %v45_v2  ;;  %v191_v7 = vpack.c.bf16 %v48_v6, %v47_v4  ;;  %v44_v8 = vld [vmem:[#allocation2] sm:$0xff]  ;;  %s145_s16 = sshll.u32 %s308_s15, 4  ;;  %s146_s16 = int_to_ptr.vmem [resolvable:$true] %s145_s16 }
  0x2a   :  { %v169_v9 = vld [vmem:[%s399_s2] ss:$0 sm:$0xff]  ;;  %s249_s17 = scalar_lea.vmem %s146_s16, 128  ;;  %p254_p3 = scmp.lt.s32.totalorder %s146_s16, %s146_s16 }
  0x2b   :  { %189 = vmatpush3.bf16.msra.mxu0 %v188_v5  ;;  %p250_p2 = scmp.ne.s32.totalorder %s146_s16, %s249_s17  ;;  %p255_p4 = scmp.lt.s32.totalorder %s249_s17, %s249_s17 }
  0x2c   :  { %190 = vmatprep.subr.bf16.mxu0 %v305_v0 }
  0x2d   :  { %p256_p5 = por %p255_p4, %p254_p3 }
  0x2f   :  { %192 = vmatpush3.bf16.msra.mxu0 %v191_v7  ;;  %p257_p6 = pnand %p256_p5, %p250_p2 }
  0x32   :  { %185 = vmatmul.mubr.msk.f32.vlgmr.msra.gmra.mrb[0].mxu0 %vm56_vm1, %v44_v8 }
 0x105   :  { %v126_v10 = vpop.f32.mrb[0].mxu0 }
 0x106   :  { %v127_v11 = vadd.f32 %v169_v9, %v126_v10  ;;  %v186_v12 = vpop.f32.mrb[1].mxu0 }
 0x108   :  { %v131_v13 = vmul.f32 1.442695, %v127_v11  ;;  %130 = vst.msk [vmem:[#allocation7] sm:$0xff] %vm56_vm1, %v127_v11 }
 0x10a   :  { %203 = vpow2.f32 %v131_v13 }
 0x10b   :  { %260 = shalt.err (!%p257_p6)
}
 0x10c   :  { %s261_s2 = scalar_lea.hbm %s400_s3, 128 }
 0x10d   :  { %p262_p7 = scmp.ne.s32.totalorder %s400_s3, %s261_s2  ;;  %p265_p8 = scmp.lt.u32.totalorder %s261_s2, %s400_s3 }
 0x10f   :  { %p267_p9 = pnand %p265_p8, %p262_p7 }
 0x111   :  { %270 = shalt.err (!%p267_p9)
}
 0x112   :  { %148 = dma.vmem_to_hbm [thread:$0]  %s146_s16, 128, %s400_s3, [#allocation4]  }
 0x113   :  { %s309_s26 = smov 96   ;;  %s310_s27 = smov [#allocation8]  }
 0x114   :  { %v204_v14 = vpop.eup %203  ;;  %s155_s28 = sshll.u32 %s310_s27, 4  ;;  %s156_s28 = int_to_ptr.vmem [resolvable:$true] %s155_s28 }
 0x115   :  { %v133_v15 = vadd.f32 0.0001, %v204_v14  ;;  %s271_s29 = scalar_lea.vmem %s156_s28, 128  ;;  %p276_p11 = scmp.lt.s32.totalorder %s156_s28, %s156_s28 }
 0x116   :  { %p272_p10 = scmp.ne.s32.totalorder %s156_s28, %s271_s29  ;;  %p277_p12 = scmp.lt.s32.totalorder %s271_s29, %s271_s29 }
 0x117   :  { %135 = vrot.lane.b32.xlu0 %v133_v15, %s309_s26 }
 0x118   :  { %p278_p13 = por %p277_p12, %p276_p11 }
 0x11a   :  { %p279_p0 = pnand %p278_p13, %p272_p10 }
 0x189   :  { %v136_v16 = vpop.permute.xlu0 %135 }
 0x18a   :  { %138 = vst.msk [vmem:[#allocation8] sm:$0xff] %vm56_vm1, %v136_v16 }
 0x18b   :  { %282 = shalt.err (!%p279_p0)
}
 0x18c   :  { %s283_s3 = scalar_lea.hbm %s401_s4, 128 }
 0x18d   :  { %p284_p1 = scmp.ne.s32.totalorder %s401_s4, %s283_s3  ;;  %p287_p2 = scmp.lt.u32.totalorder %s283_s3, %s401_s4 }
 0x18f   :  { %p289_p3 = pnand %p287_p2, %p284_p1 }
 0x191   :  { %292 = shalt.err (!%p289_p3)
}
 0x192   :  { %158 = dma.vmem_to_hbm [thread:$0]  %s156_s28, 128, %s401_s4, [#allocation9]  }
 0x193   :  { %297 = dma.done.wait [#allocation4], 128  }
 0x194   :  { %298 = vsyncadd [#allocation4], 4294967168 }
 0x195   :  { %299 = dma.done.wait [#allocation9], 128  }
 0x196   :  { %300 = vsyncadd [#allocation9], 4294967168 }
 0x197   :  { %165 = vsyncpa [#allocation3], 1 }
 0x198   :  { %166 = vsyncpa [#allocation6], 1 }
 0x199   :  { %167 = vsyncpa [#allocation4], 1 }
 0x19a   :  { %168 = vsyncpa [#allocation9], 1 }

</bundles_post_ra>
